<compile_context>
chip_gen: v6e
topology: v6e:2x2x1
jax: 0.10.0
libtpu: 0.0.40
codegen_flags: <defaults>
</compile_context>

<pallas_src>
import jax
import jax.numpy as jnp
from jax.experimental import pallas as pl
from jax.experimental.pallas import tpu as pltpu


# ----------------------------------------------------------------------------
# small helpers
# ----------------------------------------------------------------------------
def _round_up(x, m):
    return (x + m - 1) // m * m


_VMEM_LIMIT = None


def _vmem_limit_bytes():
    """Generation-aware scoped-VMEM limit (v7x has only 64 MiB per TC)."""
    global _VMEM_LIMIT
    if _VMEM_LIMIT is None:
        try:
            cap = int(pltpu.get_tpu_info().vmem_capacity_bytes)
        except Exception:
            cap = 64 << 20  # conservative: v7x physical size
        _VMEM_LIMIT = (min(cap, 128 << 20) * 3) // 4
    return _VMEM_LIMIT


def _tile_budget_bytes():
    # Headroom: tiles (double-buffered) may use at most half the scoped limit.
    return _vmem_limit_bytes() // 2


def _plan_m(m, target=256):
    """M padded to a multiple of 16 (bf16 sublane pack); tiles of ~`target`
    rows, never below 16, balanced across the (ceil) number of steps."""
    m_pad = _round_up(max(m, 16), 16)
    steps = -(-m_pad // target)
    tm = _round_up(-(-m_pad // steps), 16)
    return steps * tm, tm


def _plan_k(k, tm, cout, has_residual):
    """K padded to a multiple of 128; pick the largest 128-multiple divisor of
    K_pad whose double-buffered footprint fits the VMEM tile budget (for
    resnet18 shapes this is the full contraction -> single K step)."""
    k_pad = _round_up(k, 128)
    budget = _tile_budget_bytes()

    def fits(tk):
        a = 2 * tm * tk * 2            # A blocks, bf16, double buffered
        b = 2 * tk * cout * 2          # B blocks, bf16, double buffered
        acc = tm * cout * 4            # f32 accumulator scratch
        out = 2 * tm * cout * 2        # output blocks
        res = 2 * tm * cout * 2 if has_residual else 0
        return a + b + acc + out + res <= budget

    best = 128
    tk = 128
    while tk <= k_pad:
        if k_pad % tk == 0 and fits(tk):
            best = tk
        tk += 128
    return k_pad, best


# ----------------------------------------------------------------------------
# explicit im2col (stem conv + 1x1 downsample convs only)
# ----------------------------------------------------------------------------
def _im2col(x, kh, kw, stride, padding):
    """x: (N, H, W, C) NHWC -> patches (N, Ho, Wo, kh*kw, C)."""
    n, h, w, c = x.shape
    xp = jnp.pad(x, ((0, 0), (padding, padding), (padding, padding), (0, 0)))
    ho = (h + 2 * padding - kh) // stride + 1
    wo = (w + 2 * padding - kw) // stride + 1
    cols = []
    for i in range(kh):
        for j in range(kw):
            cols.append(
                xp[:,
                   i: i + stride * (ho - 1) + 1: stride,
                   j: j + stride * (wo - 1) + 1: stride,
                   :]
            )
    patches = jnp.stack(cols, axis=3)  # (N, Ho, Wo, kh*kw, C)
    return patches, ho, wo


# ----------------------------------------------------------------------------
# phase-split flattening (implicit im2col for 3x3 convs and the maxpool)
# ----------------------------------------------------------------------------
def _phase_split(x, kh, kw, stride, padding, pad_value):
    """x: (N,H,W,C) -> (xflat (N, s*s*Lp, C), tap_offsets, Ho, Wo, W2, M).

    The conv/pool output at flat position m = r*W2 + c (0<=r<Ho, 0<=c<W2) for
    tap t reads xflat[n, tap_offsets[t] + m, :].  Columns c >= Wo are garbage
    and sliced away by the caller; the per-phase slack rows guarantee all tap
    slices stay in bounds.
    """
    n, h, w, c = x.shape
    s = stride
    ho = (h + 2 * padding - kh) // s + 1
    wo = (w + 2 * padding - kw) // s + 1
    hp = _round_up(h + 2 * padding, s)
    wp = _round_up(w + 2 * padding, s)
    xp = jnp.pad(
        x,
        ((0, 0), (padding, hp - h - padding), (padding, wp - w - padding), (0, 0)),
        constant_values=pad_value,
    )
    h2, w2 = hp // s, wp // s
    # (N, h2, s, w2, s, C) -> (N, s_i, s_j, h2, w2, C) -> (N, s*s, h2*w2, C)
    xr = xp.reshape(n, h2, s, w2, s, c).transpose(0, 2, 4, 1, 3, 5)
    xr = xr.reshape(n, s * s, h2 * w2, c)
    lp = _round_up(h2 * w2 + w2 + 8, 8)  # slack for the last tap's overshoot
    xr = jnp.pad(xr, ((0, 0), (0, 0), (0, lp - h2 * w2), (0, 0)),
                 constant_values=pad_value)
    xflat = xr.reshape(n, s * s * lp, c)
    taps = []
    for i in range(kh):
        for j in range(kw):
            phase = (i % s) * s + (j % s)
            off = (i // s) * w2 + (j // s)
            taps.append(phase * lp + off)
    m = ho * w2
    return xflat, taps, ho, wo, w2, m


# ----------------------------------------------------------------------------
# Pallas kernels
# ----------------------------------------------------------------------------
def _make_matmul_kernel(apply_relu, add_residual, single_k):
    """Fused matmul + BN shift (+ residual) (+ relu).  Single-K variant has no
    scratch accumulator; multi-K variant folds the shift into the init."""
    if single_k:
        def kernel(a_ref, b_ref, s_ref, *rest):
            if add_residual:
                r_ref, o_ref = rest
            else:
                (o_ref,) = rest
            acc = jnp.dot(a_ref[...], b_ref[...],
                          preferred_element_type=jnp.float32)
            acc = acc + s_ref[...]
            if add_residual:
                acc = acc + r_ref[...].astype(jnp.float32)
            if apply_relu:
                acc = jnp.maximum(acc, 0.0)
            o_ref[...] = acc.astype(o_ref.dtype)
        return kernel

    def kernel(a_ref, b_ref, s_ref, *rest):
        if add_residual:
            r_ref, o_ref, acc_ref = rest
        else:
            o_ref, acc_ref = rest
        k = pl.program_id(1)

        @pl.when(k == 0)
        def _():
            acc_ref[...] = jnp.broadcast_to(s_ref[...], acc_ref.shape)

        acc_ref[...] += jnp.dot(a_ref[...], b_ref[...],
                                preferred_element_type=jnp.float32)

        @pl.when(k == pl.num_programs(1) - 1)
        def _():
            acc = acc_ref[...]
            if add_residual:
                acc = acc + r_ref[...].astype(jnp.float32)
            if apply_relu:
                acc = jnp.maximum(acc, 0.0)
            o_ref[...] = acc.astype(o_ref.dtype)

    return kernel


def fused_matmul_bn(a, b_scaled, shift, residual=None, relu=False,
                    out_dtype=jnp.bfloat16):
    """a: (M, K)  b_scaled: (K, Cout) (BN scale folded)  shift: (Cout,)."""
    m, k = a.shape
    _, cout = b_scaled.shape

    m_pad, tm = _plan_m(m)
    k_pad, tk = _plan_k(k, tm, cout, residual is not None)

    if m_pad != m:
        a = jnp.pad(a, ((0, m_pad - m), (0, 0)))
        if residual is not None:
            residual = jnp.pad(residual, ((0, m_pad - m), (0, 0)))
    if k_pad != k:
        a = jnp.pad(a, ((0, 0), (0, k_pad - k)))
        b_scaled = jnp.pad(b_scaled, ((0, k_pad - k), (0, 0)))

    a = a.astype(jnp.bfloat16)
    b_scaled = b_scaled.astype(jnp.bfloat16)
    shift2 = shift.reshape(1, cout).astype(jnp.float32)

    single_k = (tk == k_pad)
    kernel = _make_matmul_kernel(relu, residual is not None, single_k)

    if single_k:
        grid = (m_pad // tm,)
        in_specs = [
            pl.BlockSpec((tm, k_pad), lambda i: (i, 0)),
            pl.BlockSpec((k_pad, cout), lambda i: (0, 0)),
            pl.BlockSpec((1, cout), lambda i: (0, 0)),
        ]
        out_spec = pl.BlockSpec((tm, cout), lambda i: (i, 0))
        if residual is not None:
            in_specs.append(pl.BlockSpec((tm, cout), lambda i: (i, 0)))
        scratch = []
        dims = ("parallel",)
    else:
        grid = (m_pad // tm, k_pad // tk)
        in_specs = [
            pl.BlockSpec((tm, tk), lambda i, j: (i, j)),
            pl.BlockSpec((tk, cout), lambda i, j: (j, 0)),
            pl.BlockSpec((1, cout), lambda i, j: (0, 0)),
        ]
        out_spec = pl.BlockSpec((tm, cout), lambda i, j: (i, 0))
        if residual is not None:
            in_specs.append(pl.BlockSpec((tm, cout), lambda i, j: (i, 0)))
        scratch = [pltpu.VMEM((tm, cout), jnp.float32)]
        dims = ("parallel", "arbitrary")

    args = [a, b_scaled, shift2]
    if residual is not None:
        args.append(residual.astype(jnp.bfloat16))

    out = pl.pallas_call(
        kernel,
        out_shape=jax.ShapeDtypeStruct((m_pad, cout), out_dtype),
        grid=grid,
        in_specs=in_specs,
        out_specs=out_spec,
        scratch_shapes=scratch,
        compiler_params=pltpu.CompilerParams(
            dimension_semantics=dims,
            vmem_limit_bytes=_vmem_limit_bytes(),
        ),
    )(*args)
    return out[:m]


def _make_implicit_conv_kernel(tap_offsets, cin, m, apply_relu, add_residual):
    """Implicit-im2col conv: kh*kw MXU matmuls over contiguous tap slices of
    the phase-split activation, accumulated into an f32 scratch initialized
    with the folded BN shift; residual/ReLU fused into the epilogue."""
    def kernel(x_ref, b_ref, s_ref, *rest):
        if add_residual:
            r_ref, o_ref, acc_ref = rest
        else:
            o_ref, acc_ref = rest
        acc_ref[...] = jnp.broadcast_to(s_ref[...], acc_ref.shape)
        for t, off in enumerate(tap_offsets):
            a = x_ref[0, pl.ds(off, m), :]                  # (M, cin) bf16
            wt = b_ref[pl.ds(t * cin, cin), :]              # (cin, cout) bf16
            acc_ref[...] += jnp.dot(a, wt, preferred_element_type=jnp.float32)
        acc = acc_ref[...]
        if add_residual:
            acc = acc + r_ref[0].astype(jnp.float32)
        if apply_relu:
            acc = jnp.maximum(acc, 0.0)
        o_ref[0] = acc.astype(o_ref.dtype)
    return kernel


def conv_bn_implicit(x, w, bn, stride, padding, relu, residual=None):
    """3x3 (stride 1/2) conv + BN (+residual) (+relu) without an HBM im2col."""
    cout, cin, kh, kw = w.shape
    n = x.shape[0]
    xflat, taps, ho, wo, w2, m = _phase_split(
        x.astype(jnp.bfloat16), kh, kw, stride, padding, 0.0)
    scale = bn["gamma"] / jnp.sqrt(bn["var"] + 1e-5)
    shift = (bn["beta"] - bn["mean"] * scale).reshape(1, cout).astype(jnp.float32)
    b = (jnp.transpose(w, (2, 3, 1, 0)).reshape(kh * kw * cin, cout)
         * scale[None, :]).astype(jnp.bfloat16)

    lflat = xflat.shape[1]
    in_specs = [
        pl.BlockSpec((1, lflat, cin), lambda i: (i, 0, 0)),
        pl.BlockSpec((kh * kw * cin, cout), lambda i: (0, 0)),
        pl.BlockSpec((1, cout), lambda i: (0, 0)),
    ]
    args = [xflat, b, shift]
    if residual is not None:
        r = jnp.pad(residual, ((0, 0), (0, 0), (0, w2 - wo), (0, 0)))
        r = r.reshape(n, m, cout).astype(jnp.bfloat16)
        in_specs.append(pl.BlockSpec((1, m, cout), lambda i: (i, 0, 0)))
        args.append(r)

    out = pl.pallas_call(
        _make_implicit_conv_kernel(taps, cin, m, relu, residual is not None),
        out_shape=jax.ShapeDtypeStruct((n, m, cout), jnp.bfloat16),
        grid=(n,),
        in_specs=in_specs,
        out_specs=pl.BlockSpec((1, m, cout), lambda i: (i, 0, 0)),
        scratch_shapes=[pltpu.VMEM((m, cout), jnp.float32)],
        compiler_params=pltpu.CompilerParams(
            dimension_semantics=("parallel",),
            vmem_limit_bytes=_vmem_limit_bytes(),
        ),
    )(*args)
    # drop the garbage columns (c >= Wo) introduced by the flat-shift trick
    return out.reshape(n, ho, w2, cout)[:, :, :wo, :]


def _make_maxpool_kernel(tap_offsets, m):
    def kernel(x_ref, o_ref):
        acc = x_ref[0, pl.ds(tap_offsets[0], m), :]
        for off in tap_offsets[1:]:
            acc = jnp.maximum(acc, x_ref[0, pl.ds(off, m), :])
        o_ref[0] = acc
    return kernel


def maxpool_3x3_s2(x):
    """3x3 stride-2 maxpool (pad 1) via the phase-split trick (no HBM stack)."""
    n, h, w, c = x.shape
    xflat, taps, ho, wo, w2, m = _phase_split(x, 3, 3, 2, 1, -jnp.inf)
    lflat = xflat.shape[1]
    out = pl.pallas_call(
        _make_maxpool_kernel(taps, m),
        out_shape=jax.ShapeDtypeStruct((n, m, c), x.dtype),
        grid=(n,),
        in_specs=[pl.BlockSpec((1, lflat, c), lambda i: (i, 0, 0))],
        out_specs=pl.BlockSpec((1, m, c), lambda i: (i, 0, 0)),
        compiler_params=pltpu.CompilerParams(
            dimension_semantics=("parallel",),
            vmem_limit_bytes=_vmem_limit_bytes(),
        ),
    )(xflat)
    return out.reshape(n, ho, w2, c)[:, :, :wo, :]


def _avgpool_kernel(x_ref, o_ref):
    o_ref[...] = jnp.mean(x_ref[...].astype(jnp.float32), axis=1)


def _avgpool_pallas(x):
    """x: (N, HW, C) -> (N, C) global average pool, f32 out (tiny)."""
    n, _, c = x.shape
    return pl.pallas_call(
        _avgpool_kernel,
        out_shape=jax.ShapeDtypeStruct((n, c), jnp.float32),
    )(x)


# ----------------------------------------------------------------------------
# ResNet-18 building blocks (glue around the Pallas kernels)
# ----------------------------------------------------------------------------
def conv_bn_explicit(x, w, bn, stride, padding, relu, residual=None):
    """im2col + fused matmul path (7x7 stem conv, 1x1 downsample convs)."""
    cout, cin, kh, kw = w.shape
    patches, ho, wo = _im2col(x, kh, kw, stride, padding)
    n = x.shape[0]
    m = n * ho * wo
    a = patches.reshape(m, kh * kw * cin)
    scale = bn["gamma"] / jnp.sqrt(bn["var"] + 1e-5)
    shift = bn["beta"] - bn["mean"] * scale
    b = jnp.transpose(w, (2, 3, 1, 0)).reshape(kh * kw * cin, cout)
    b = b * scale[None, :]
    r = residual.reshape(m, cout) if residual is not None else None
    out = fused_matmul_bn(a, b, shift, residual=r, relu=relu)
    return out.reshape(n, ho, wo, cout)


def conv_bn(x, w, bn, stride, padding, relu, residual=None):
    cout, cin, kh, kw = w.shape
    if kh * kw > 1 and cin >= 8:
        return conv_bn_implicit(x, w, bn, stride, padding, relu, residual)
    return conv_bn_explicit(x, w, bn, stride, padding, relu, residual)


def basic_block(x, blk):
    identity = x
    out = conv_bn(x, blk["conv1"], blk["bn1"], stride=blk["stride"],
                  padding=1, relu=True)
    if "ds_conv" in blk:
        identity = conv_bn(x, blk["ds_conv"], blk["ds_bn"],
                           stride=blk["stride"], padding=0, relu=False)
    out = conv_bn(out, blk["conv2"], blk["bn2"], stride=1, padding=1,
                  relu=True, residual=identity)
    return out


def encoder_forward(x_nchw, params):
    """Input NCHW (PyTorch convention) -> features (N, 512)."""
    x = jnp.transpose(x_nchw, (0, 2, 3, 1)).astype(jnp.bfloat16)  # NHWC
    x = conv_bn(x, params["conv1"], params["bn1"], stride=2, padding=3, relu=True)
    x = maxpool_3x3_s2(x)
    for blocks in params["layers"]:
        for blk in blocks:
            x = basic_block(x, blk)
    n, h, w, c = x.shape
    feat = _avgpool_pallas(x.reshape(n, h * w, c))  # (N, 512); fc = Identity
    return feat


# ----------------------------------------------------------------------------
# deterministic parameter initialization (shapes match torchvision resnet18)
# ----------------------------------------------------------------------------
def _make_conv(key, cout, cin, kh, kw):
    fan_in = cin * kh * kw
    return jax.random.normal(key, (cout, cin, kh, kw), jnp.float32) / jnp.sqrt(fan_in)


def _make_bn(key, c):
    k1, k2 = jax.random.split(key)
    return dict(
        gamma=1.0 + 0.1 * jax.random.normal(k1, (c,), jnp.float32),
        beta=0.1 * jax.random.normal(k2, (c,), jnp.float32),
        mean=jnp.zeros((c,), jnp.float32),
        var=jnp.ones((c,), jnp.float32),
    )


def init_params(key):
    keys = iter(jax.random.split(key, 128))
    params = {
        "conv1": _make_conv(next(keys), 64, 3, 7, 7),
        "bn1": _make_bn(next(keys), 64),
    }
    cfg = [(64, 2, 1), (128, 2, 2), (256, 2, 2), (512, 2, 2)]
    in_planes = 64
    layers = []
    for planes, nblocks, stride in cfg:
        blocks = []
        for b in range(nblocks):
            s = stride if b == 0 else 1
            blk = {
                "stride": s,
                "conv1": _make_conv(next(keys), planes, in_planes, 3, 3),
                "bn1": _make_bn(next(keys), planes),
                "conv2": _make_conv(next(keys), planes, planes, 3, 3),
                "bn2": _make_bn(next(keys), planes),
            }
            if s != 1 or in_planes != planes:
                blk["ds_conv"] = _make_conv(next(keys), planes, in_planes, 1, 1)
                blk["ds_bn"] = _make_bn(next(keys), planes)
            blocks.append(blk)
            in_planes = planes
        layers.append(blocks)
    params["layers"] = layers
    return params


# ----------------------------------------------------------------------------
if __name__ == "__main__":
    key = jax.random.PRNGKey(0)
    pkey, xkey = jax.random.split(key)
    params = init_params(pkey)
    # small shapes: batch=2, channels=3 (RGB as resnet18 expects), spatial=32
    x = jax.random.normal(xkey, (2, 3, 32, 32), jnp.float32)
    out = encoder_forward(x, params)
    out = jax.block_until_ready(out)
    assert out.shape == (2, 512), out.shape
    assert bool(jnp.all(jnp.isfinite(out)))
    print("KERNEL_OK")
</pallas_src>

<mosaic_0001>
module attributes {stable_mosaic.version = 11 : i64} {
  func.func @kernel(%arg0: i32, %arg1: memref<256x256xbf16, #tpu.memory_space<vmem>>, %arg2: memref<256x64xbf16, #tpu.memory_space<vmem>>, %arg3: memref<1x64xf32, #tpu.memory_space<vmem>>, %arg4: memref<256x64xbf16, #tpu.memory_space<vmem>>) attributes {dimension_semantics = [#tpu.dimension_semantics<parallel>], iteration_bounds = array<i64: 2>, scalar_prefetch = 0 : i64, scratch_operands = 0 : i64, tpu.core_type = #tpu.core_type<tc>, window_params = [{transform_indices = @transform_0, window_bounds = array<i64: 256, 256>}, {pipeline_mode = #tpu.pipeline_mode<synchronous>, transform_indices = @transform_1, window_bounds = array<i64: 256, 64>}, {pipeline_mode = #tpu.pipeline_mode<synchronous>, transform_indices = @transform_2, window_bounds = array<i64: 1, 64>}, {transform_indices = @transform_3, window_bounds = array<i64: 256, 64>}]} {
    %c0 = arith.constant 0 : index
    %c0_0 = arith.constant 0 : index
    %0 = vector.load %arg1[%c0, %c0_0] : memref<256x256xbf16, #tpu.memory_space<vmem>>, vector<256x256xbf16>
    %c0_1 = arith.constant 0 : index
    %c0_2 = arith.constant 0 : index
    %1 = vector.load %arg2[%c0_1, %c0_2] : memref<256x64xbf16, #tpu.memory_space<vmem>>, vector<256x64xbf16>
    %cst = arith.constant dense<0.000000e+00> : vector<256x64xf32>
    %2 = tpu.matmul %0, %1, %cst {dimension_numbers = #tpu.dot_dimension_numbers<[1], [0], [0], [1], [0, 0, 1, 1], [], []>} : vector<256x256xbf16>, vector<256x64xbf16>, vector<256x64xf32> -> vector<256x64xf32>
    %c0_3 = arith.constant 0 : index
    %c0_4 = arith.constant 0 : index
    %3 = vector.load %arg3[%c0_3, %c0_4] : memref<1x64xf32, #tpu.memory_space<vmem>>, vector<1x64xf32>
    %4 = vector.broadcast %3 : vector<1x64xf32> to vector<256x64xf32>
    %5 = arith.addf %2, %4 : vector<256x64xf32>
    %cst_5 = arith.constant 0.000000e+00 : f32
    %6 = vector.broadcast %cst_5 : f32 to vector<256x64xf32>
    %7 = arith.maximumf %5, %6 : vector<256x64xf32>
    %8 = arith.truncf %7 : vector<256x64xf32> to vector<256x64xbf16>
    %c0_6 = arith.constant 0 : index
    %c0_7 = arith.constant 0 : index
    %9 = vector.load %arg4[%c0_6, %c0_7] : memref<256x64xbf16, #tpu.memory_space<vmem>>, vector<256x64xbf16>
    tpu.vector_store %arg4[%c0_6, %c0_7], %8 {strides = array<i32>} : memref<256x64xbf16, #tpu.memory_space<vmem>>, vector<256x64xbf16>,
    return
  }
  func.func @transform_0(%arg0: i32) -> (i32, i32) {
    %c0_i32 = arith.constant 0 : i32
    %c0_i32_0 = arith.constant 0 : i32
    return %arg0, %c0_i32 : i32, i32
  }
  func.func @transform_1(%arg0: i32) -> (i32, i32) {
    %c0_i32 = arith.constant 0 : i32
    %c0_i32_0 = arith.constant 0 : i32
    %c0_i32_1 = arith.constant 0 : i32
    return %c0_i32, %c0_i32_0 : i32, i32
  }
  func.func @transform_2(%arg0: i32) -> (i32, i32) {
    %c0_i32 = arith.constant 0 : i32
    %c0_i32_0 = arith.constant 0 : i32
    %c0_i32_1 = arith.constant 0 : i32
    return %c0_i32, %c0_i32_0 : i32, i32
  }
  func.func @transform_3(%arg0: i32) -> (i32, i32) {
    %c0_i32 = arith.constant 0 : i32
    %c0_i32_0 = arith.constant 0 : i32
    return %arg0, %c0_i32 : i32, i32
  }
}

</mosaic_0001>

<bundles_post_ra>
// kernel: tpu_custom_call.1
= control target key start
LH: loop header
LB: loop body
LE: loop exit
PB: predicated region body
PF: predicated region fallthrough
CT: control target
= control target key end

     0   :  { %8 = vsyncpa [#allocation3], 0  ;;  %s1677_s0 = inlined_call_operand.hbm [shape: bf16[512,256], index: 0, kind: input, shape index: {}]   ;;  %s1678_s1 = inlined_call_operand.vmem [shape: bf16[256,64], index: 1, kind: input, shape index: {}]   ;;  %s1679_s2 = inlined_call_operand.vmem [shape: f32[1,64], index: 2, kind: input, shape index: {}]   ;;  %s1680_s3 = inlined_call_operand.vmem [shape: bf16[512,64], index: 3, kind: output, shape index: {}]  }
   0x1   :  { %10 = vsyncpa [#allocation3 + $0x1], 0  ;;  %s1392_s12 = smov 0   ;;  %s1394_s13 = smov 0  }
   0x2   :  { %s1396_s14 = smov 0   ;;  %s1398_s15 = smov 0  }
   0x3 LB: > { %s943_s16 = sadd.s32 4294967295, %s1367_s15   ;;  %s1412_s17 = sadd.s32 1, %s1367_s15   ;;  %s1367_s15 = sphi %s1398_s15, %s1689_s15   ;;  %s1363_s14 = sphi %s1396_s14, %s1688_s14   ;;  %s1359_s13 = sphi %s1394_s13, %s1687_s13   ;;  %s1355_s12 = sphi %s1392_s12, %s1686_s12  }
   0x4   : > { %s20_s18 = ssub.s32 %s1367_s15, %s1412_s17  ;;  %s23_s19 = sadd.s32 1, %s1363_s14 }
   0x5   : > { %p21_p0 = scmp.eq.s32.totalorder %s20_s18, 0  ;;  %p30_p1 = scmp.ne.s32.totalorder %s1363_s14, %s1359_s13 }
   0x6   : > { %p31_p2 = scmp.eq.s32.totalorder %s1367_s15, 0  ;;  %p36_p3 = scmp.ne.s32.totalorder %s1359_s13, %s1355_s12 }
   0x7   : > { %s1422_s20 = scalar_select %p21_p0, %s1363_s14, %s23_s19  }
   0x8   : > { %p32_p4 = por %p31_p2, %p30_p1  ;;  %p37_p5 = scmp.eq.s32.totalorder %s943_s16, 0 }
   0x9   : > { %p1206_p6 = scmp.lt.s32.totalorder %s1367_s15, 2  ;;  %s134_s22 = sand.u32 1, %s1363_s14  }
   0xa   : > { %p1427_p7 = por %p37_p5, %p36_p3  ;;  %s947_s23 = sshll.u32 %s134_s22, 8 }
   0xb   : > { %s1039_s24 = sshll.u32 %s1367_s15, 12  ;;  %s138_s28 = scalar_lea.vmem [#allocation2], %s947_s23 }
   0xc   : > { %s1682_s21 = scalar_select %p1427_p7, 1, 0 }
   0xd   : > { %s1436_s27 = scalar_lea.hbm %s1677_s0, %s1039_s24  ;;  %s146_s29 = sshll.u32 %s138_s28, 4  ;;  %s1438_s29 = int_to_ptr.vmem [resolvable:$true] %s146_s29 }
   0xe   : > { %p1440_p8 = pnand %p1206_p6, %p32_p4  ;;  %s1445_s4 = scalar_lea.sflag [#allocation3], %s134_s22 }
   0xf   : > { %s1305_s5 = scalar_lea.hbm %s1436_s27, 4096  ;;  %s1310_s8 = scalar_lea.hbm %s1677_s0, 8192 }
  0x10   : > { %p1306_p10 = scmp.ne.s32.totalorder %s1436_s27, %s1305_s5  ;;  %p1307_p11 = pneg %p1440_p8 }
  0x11   : > { %p1311_p0 = scmp.lt.s32.totalorder %s1436_s27, %s1677_s0  ;;  %p1312_p1 = scmp.lt.s32.totalorder %s1310_s8, %s1305_s5 }
  0x12   : > { %p1308_p12 = pnand %p1307_p11, %p1306_p10 }
  0x13   : > { %p1313_p2 = por %p1312_p1, %p1311_p0 }
  0x14   : > { %p1309_p13 = pneg %p1308_p12 }
  0x16   : > { %p1314_p3 = pnand %p1313_p2, %p1309_p13 }
  0x18   : > { %1317 = shalt.err (!%p1314_p3)
}
  0x19   : > { %s1318_s11 = scalar_lea.vmem %s1438_s29, 4096  ;;  %s1369_s12 = smov [#allocation2]  }
  0x1a   : > { %p1319_p4 = scmp.ne.s32.totalorder %s1438_s29, %s1318_s11  ;;  %s1323_s18 = sshll.u32 %s1369_s12, 4  ;;  %s1324_s18 = int_to_ptr.vmem [resolvable:$false] %s1323_s18 }
  0x1b   : > { %s1325_s19 = scalar_lea.vmem %s1324_s18, 8192  ;;  %p1326_p10 = scmp.lt.s32.totalorder %s1438_s29, %s1324_s18 }
  0x1c   : > { %p1321_p5 = pnand %p1319_p4, %p1307_p11  ;;  %p1327_p12 = scmp.lt.s32.totalorder %s1325_s19, %s1318_s11 }
  0x1e   : > { %p1322_p6 = pneg %p1321_p5  ;;  %p1328_p9 = por %p1327_p12, %p1326_p10 }
  0x20   : > { %p1329_p7 = pnand %p1328_p9, %p1322_p6 }
  0x22   : > { %1332 = shalt.err (!%p1329_p7)
}
  0x23   : > { %s1370_s22 = smov 128   ;;  %s1371_s23 = smov 8  }
  0x24   : > { %1205 = dma.hbm_to_vmem [thread:$0]  (!%p1440_p8), %s1436_s27, 4096, %s1438_s29, %s1445_s4, %s1370_s22, %s1370_s22, %s1371_s23  }
  0x25   : > { %p154_p11 = scmp.lt.s32.totalorder %s1367_s15, 3  ;;  %p1684_p13 = scmp.ge.s32.totalorder %s1367_s15, 1 }
  0x27   : > { %p155_p0 = pnand %p1684_p13, %p154_p11 }
  0x28   : > { %s160_s24 = sand.u32 (!%p155_p0), 1, %s1359_s13   ;;  %p1685_p7 = scmp.ne.s32.totalorder (!%p155_p0), %s1682_s21, 0 }
  0x29   : > { %158 = sbr.rel (%p155_p0) target bundleno = 344 (0x158), region = 32  ;;  %s952_s25 = sshll.u32 (!%p155_p0), %s160_s24, 8 }
  0x2a   : > { %s161_s26 = scalar_lea.sflag (!%p155_p0), [#allocation3], %s160_s24  ;;  %s1470_s28 = scalar_lea.vmem (!%p155_p0), [#allocation2], %s952_s25 }
  0x2e   : > { %1350 = dma.done.wait (%p1685_p7), %s161_s26, 4096  }
  0x2f   : > { %1352 = vsyncadd (%p1685_p7), %s161_s26, 4294963200  ;;  %v1241_v0 = vld [vmem:[%s1678_s1 + $0x78] sm:$0xff]   ;;  %v1243_v2 = vld [vmem:[%s1678_s1 + $0x70] sm:$0xff]   ;;  %s953_s12 = sshll.u32 %s943_s16, 5  ;;  %vm843_vm0 = vcmask 519168  }
  0x30   : > { %v1242_v1 = vld [vmem:[%s1678_s1 + $0x38] sm:$0xff]   ;;  %1072 = vmatprep.subr.bf16.mxu0 %v1241_v0  ;;  %1184 = vmatprep.subr.bf16.mxu1 %v1241_v0  ;;  %v1244_v3 = vld [vmem:[%s1678_s1 + $0x30] sm:$0xff]   ;;  %v1245_v4 = vld [vmem:[%s1678_s1 + $0x68] sm:$0xff]   ;;  %p189_p8 = scmp.lt.s32.totalorder %s953_s12, 63 }
  0x31   : > { %1073 = vmatpush3.bf16.msra.mxu0 %v1242_v1  ;;  %1192 = vmatpush3.bf16.msra.mxu1 %v1242_v1  ;;  %v1246_v5 = vld [vmem:[%s1678_s1 + $0x28] sm:$0xff]   ;;  %v1247_v6 = vld [vmem:[%s1678_s1 + $0x60] sm:$0xff]   ;;  %v1249_v8 = vld [vmem:[%s1678_s1 + $0x58] sm:$0xff]  }
  0x32   : > { %1074 = vmatprep.subr.bf16.mxu0 %v1243_v2  ;;  %1185 = vmatprep.subr.bf16.mxu1 %v1243_v2  ;;  %v1248_v7 = vld [vmem:[%s1678_s1 + $0x20] sm:$0xff]   ;;  %v1250_v9 = vld [vmem:[%s1678_s1 + $0x18] sm:$0xff]   ;;  %v1251_v10 = vld [vmem:[%s1678_s1 + $0x50] sm:$0xff]   ;;  %s1691_s12 = smov (!%p189_p8, %s953_s12), 63 }
  0x33   : > { %v1259_v11 = vld [vmem:[%s1470_s28 + $0x4] ss:$8 sps:$4 sm:$0xff]   ;;  %v1252_v13 = vld [vmem:[%s1678_s1 + $0x10] sm:$0xff]   ;;  %v1257_v18 = vld [vmem:[%s1470_s28] ss:$8 sps:$4 sm:$0xff]  }
  0x34   : > { %v1262_v12 = vld [vmem:[%s1470_s28 + $0x84] ss:$8 sps:$4 sm:$0xff]   ;;  %554 = vmatprep.mubr.bf16.mxu0 %v1259_v11  ;;  %v1260_v19 = vld [vmem:[%s1470_s28 + $0x80] ss:$8 sps:$4 sm:$0xff]   ;;  %v1263_v20 = vld [vmem:[%s1470_s28 + $0x14] ss:$8 sps:$4 sm:$0xff]  }
  0x35   : > { %1075 = vmatpush3.bf16.msra.mxu0 %v1244_v3  ;;  %1193 = vmatpush3.bf16.msra.mxu1 %v1244_v3  ;;  %v1253_v14 = vld [vmem:[%s1678_s1 + $0x48] sm:$0xff]   ;;  %v1255_v16 = vld [vmem:[%s1678_s1 + $0x40] sm:$0xff]   ;;  %v1265_v21 = vld [vmem:[%s1470_s28 + $0x94] ss:$8 sps:$4 sm:$0xff]  }
  0x36   : > { %1076 = vmatprep.subr.bf16.mxu0 %v1245_v4  ;;  %1186 = vmatprep.subr.bf16.mxu1 %v1245_v4  ;;  %v1254_v15 = vld [vmem:[%s1678_s1 + $0x8] sm:$0xff]   ;;  %v1256_v17 = vld [vmem:[%s1678_s1] sm:$0xff]   ;;  %v1267_v22 = vld [vmem:[%s1470_s28 + $0x10] ss:$8 sps:$4 sm:$0xff]  }
  0x37   : > { %618 = vmatprep.mubr.bf16.mxu1 %v1262_v12  ;;  %v1268_v23 = vld [vmem:[%s1470_s28 + $0x90] ss:$8 sps:$4 sm:$0xff]   ;;  %v1269_v24 = vld [vmem:[%s1470_s28 + $0x24] ss:$8 sps:$4 sm:$0xff]   ;;  %v1273_v26 = vld [vmem:[%s1470_s28 + $0x20] ss:$8 sps:$4 sm:$0xff]  }
  0x38   : > { %v1271_v25 = vld [vmem:[%s1470_s28 + $0xa4] ss:$8 sps:$4 sm:$0xff]   ;;  %v1274_v27 = vld [vmem:[%s1470_s28 + $0xa0] ss:$8 sps:$4 sm:$0xff]   ;;  %v1275_v28 = vld [vmem:[%s1470_s28 + $0x34] ss:$8 sps:$4 sm:$0xff]  }
  0x39   : > { %1077 = vmatpush3.bf16.msra.mxu0 %v1246_v5  ;;  %1194 = vmatpush3.bf16.msra.mxu1 %v1246_v5  ;;  %v1277_v29 = vld [vmem:[%s1470_s28 + $0xb4] ss:$8 sps:$4 sm:$0xff]   ;;  %v1279_v30 = vld [vmem:[%s1470_s28 + $0x30] ss:$8 sps:$4 sm:$0xff]   ;;  %v1281_v32 = vld [vmem:[%s1470_s28 + $0x44] ss:$8 sps:$4 sm:$0xff]  }
  0x3a   : > { %1078 = vmatprep.subr.bf16.mxu0 %v1247_v6  ;;  %1187 = vmatprep.subr.bf16.mxu1 %v1247_v6  ;;  %v1280_v31 = vld [vmem:[%s1470_s28 + $0xb0] ss:$8 sps:$4 sm:$0xff]   ;;  %v1283_v33 = vld [vmem:[%s1470_s28 + $0xc4] ss:$8 sps:$4 sm:$0xff]   ;;  %v1285_v34 = vld [vmem:[%s1470_s28 + $0x40] ss:$8 sps:$4 sm:$0xff]  }
  0x3b   : > { %v1286_v35 = vld [vmem:[%s1470_s28 + $0xc0] ss:$8 sps:$4 sm:$0xff]   ;;  %v1287_v36 = vld [vmem:[%s1470_s28 + $0x54] ss:$8 sps:$4 sm:$0xff]   ;;  %v1291_v38 = vld [vmem:[%s1470_s28 + $0x50] ss:$8 sps:$4 sm:$0xff]  }
  0x3c   : > { %v1289_v37 = vld [vmem:[%s1470_s28 + $0xd4] ss:$8 sps:$4 sm:$0xff]   ;;  %v1292_v39 = vld [vmem:[%s1470_s28 + $0xd0] ss:$8 sps:$4 sm:$0xff]   ;;  %v1293_v40 = vld [vmem:[%s1470_s28 + $0x64] ss:$8 sps:$4 sm:$0xff]  }
  0x3d   : > { %1079 = vmatpush3.bf16.msra.mxu0 %v1248_v7  ;;  %1195 = vmatpush3.bf16.msra.mxu1 %v1248_v7  ;;  %v1295_v41 = vld [vmem:[%s1470_s28 + $0xe4] ss:$8 sps:$4 sm:$0xff]   ;;  %v1297_v42 = vld [vmem:[%s1470_s28 + $0x60] ss:$8 sps:$4 sm:$0xff]   ;;  %v1299_v44 = vld [vmem:[%s1470_s28 + $0x74] ss:$8 sps:$4 sm:$0xff]  }
  0x3e   : > { %1080 = vmatprep.subr.bf16.mxu0 %v1249_v8  ;;  %1188 = vmatprep.subr.bf16.mxu1 %v1249_v8  ;;  %v1298_v43 = vld [vmem:[%s1470_s28 + $0xe0] ss:$8 sps:$4 sm:$0xff]   ;;  %v1301_v45 = vld [vmem:[%s1470_s28 + $0xf4] ss:$8 sps:$4 sm:$0xff]   ;;  %v1303_v46 = vld [vmem:[%s1470_s28 + $0x70] ss:$8 sps:$4 sm:$0xff]  }
  0x3f   : > { %v1304_v47 = vld [vmem:[%s1470_s28 + $0xf0] ss:$8 sps:$4 sm:$0xff]   ;;  %v1561_v50 = vld [vmem:[%s1679_s2] ss:$0 sm:$0xff]  ;;  %s954_s28 = sshll.u32 %s1691_s12, 2 }
  0x40   : > { %s1568_s22 = scalar_lea.vmem %s1680_s3, %s954_s28 }
  0x41   : > { %1081 = vmatpush3.bf16.msra.mxu0 %v1250_v9  ;;  %1196 = vmatpush3.bf16.msra.mxu1 %v1250_v9 }
  0x42   : > { %1082 = vmatprep.subr.bf16.mxu0 %v1251_v10  ;;  %1189 = vmatprep.subr.bf16.mxu1 %v1251_v10 }
  0x45   : > { %1083 = vmatpush3.bf16.msra.mxu0 %v1252_v13  ;;  %1197 = vmatpush3.bf16.msra.mxu1 %v1252_v13 }
  0x46   : > { %1084 = vmatprep.subr.bf16.mxu0 %v1253_v14  ;;  %1190 = vmatprep.subr.bf16.mxu1 %v1253_v14 }
  0x49   : > { %1085 = vmatpush3.bf16.msra.mxu0 %v1254_v15  ;;  %1198 = vmatpush3.bf16.msra.mxu1 %v1254_v15 }
  0x4a   : > { %1086 = vmatprep.subr.bf16.mxu0 %v1255_v16  ;;  %1191 = vmatprep.subr.bf16.mxu1 %v1255_v16 }
  0x4d   : > { %1087 = vmatpush3.bf16.msra.mxu0 %v1256_v17  ;;  %1199 = vmatpush3.bf16.msra.mxu1 %v1256_v17 }
  0x50   : > { %555 = vmatmul.mubr.bf16.vlgmr.msra.gmra.mxu0 %v1257_v18  ;;  %619 = vmatmul.mubr.bf16.vlgmr.msra.gmra.mxu1 %v1260_v19 }
  0x51   : > { %562 = vmatprep.mubr.bf16.mxu0 %v1263_v20  ;;  %626 = vmatprep.mubr.bf16.mxu1 %v1265_v21 }
  0x58   : > { %563 = vmatmul.mubr.bf16.gmra.mxu0 %v1267_v22  ;;  %627 = vmatmul.mubr.bf16.gmra.mxu1 %v1268_v23 }
  0x59   : > { %570 = vmatprep.mubr.bf16.mxu0 %v1269_v24  ;;  %634 = vmatprep.mubr.bf16.mxu1 %v1271_v25 }
  0x60   : > { %571 = vmatmul.mubr.bf16.gmra.mxu0 %v1273_v26  ;;  %635 = vmatmul.mubr.bf16.gmra.mxu1 %v1274_v27 }
  0x61   : > { %578 = vmatprep.mubr.bf16.mxu0 %v1275_v28  ;;  %642 = vmatprep.mubr.bf16.mxu1 %v1277_v29 }
  0x68   : > { %579 = vmatmul.mubr.bf16.gmra.mxu0 %v1279_v30  ;;  %643 = vmatmul.mubr.bf16.gmra.mxu1 %v1280_v31 }
  0x69   : > { %586 = vmatprep.mubr.bf16.mxu0 %v1281_v32  ;;  %650 = vmatprep.mubr.bf16.mxu1 %v1283_v33 }
  0x70   : > { %587 = vmatmul.mubr.bf16.gmra.mxu0 %v1285_v34  ;;  %651 = vmatmul.mubr.bf16.gmra.mxu1 %v1286_v35 }
  0x71   : > { %594 = vmatprep.mubr.bf16.mxu0 %v1287_v36  ;;  %658 = vmatprep.mubr.bf16.mxu1 %v1289_v37 }
  0x78   : > { %595 = vmatmul.mubr.bf16.gmra.mxu0 %v1291_v38  ;;  %659 = vmatmul.mubr.bf16.gmra.mxu1 %v1292_v39 }
  0x79   : > { %602 = vmatprep.mubr.bf16.mxu0 %v1293_v40  ;;  %666 = vmatprep.mubr.bf16.mxu1 %v1295_v41 }
  0x80   : > { %603 = vmatmul.mubr.bf16.gmra.mxu0 %v1297_v42  ;;  %667 = vmatmul.mubr.bf16.gmra.mxu1 %v1298_v43 }
  0x81   : > { %610 = vmatprep.mubr.bf16.mxu0 %v1299_v44  ;;  %674 = vmatprep.mubr.bf16.mxu1 %v1301_v45 }
  0x88   : > { %611 = vmatmul.mubr.bf16.gmra.mxu0 %v1303_v46  ;;  %675 = vmatmul.mubr.bf16.gmra.mxu1 %v1304_v47 }
 0x110   : > { %v1088_v48 = vpop.f32.mrf.mxu0  ;;  %v1136_v49 = vpop.f32.mrf.mxu1 }
 0x112   : > { %v1089_v51 = vpop.f32.mrf.mxu0  ;;  %v1137_v52 = vpop.f32.mrf.mxu1 }
 0x113   : > { %v1090_v53 = vadd.f32 %v1089_v51, %v1088_v48  ;;  %v1138_v54 = vadd.f32 %v1137_v52, %v1136_v49 }
 0x114   : > { %v1091_v55 = vpop.f32.mrf.mxu0  ;;  %v1139_v56 = vpop.f32.mrf.mxu1 }
 0x115   : > { %v557_v57 = vadd.f32 %v1090_v53, %v1561_v50  ;;  %v621_v58 = vadd.f32 %v1138_v54, %v1561_v50 }
 0x116   : > { %v1092_v59 = vpop.f32.mrf.mxu0  ;;  %v1140_v60 = vpop.f32.mrf.mxu1 }
 0x117   : > { %v683_v61 = vmax.f32 %v557_v57, 0.0  ;;  %v699_v62 = vmax.f32 %v621_v58, 0.0  ;;  %v1093_v63 = vadd.f32 %v1092_v59, %v1091_v55  ;;  %v1141_v0 = vadd.f32 %v1140_v60, %v1139_v56 }
 0x118   : > { %v1094_v1 = vpop.f32.mrf.mxu0  ;;  %v1142_v2 = vpop.f32.mrf.mxu1 }
 0x119   : > { %v1040_v3 = vpack.c.bf16 %v683_v61, %v683_v61  ;;  %v1056_v4 = vpack.c.bf16 %v699_v62, %v699_v62  ;;  %v560_v5 = vadd.f32 %v1093_v63, %v1561_v50  ;;  %v624_v6 = vadd.f32 %v1141_v0, %v1561_v50 }
 0x11a   : > { %v1095_v7 = vpop.f32.mrf.mxu0  ;;  %v1143_v8 = vpop.f32.mrf.mxu1 }
 0x11b   : > { %844 = vst.msk [vmem:[%s1568_s22] sm:$0xf] %vm843_vm0, %v1040_v3  ;;  %860 = vst.msk [vmem:[%s1568_s22 + $0x40] sm:$0xf] %vm843_vm0, %v1056_v4  ;;  %v684_v9 = vmax.f32 %v560_v5, 0.0  ;;  %v700_v10 = vmax.f32 %v624_v6, 0.0  ;;  %v1096_v11 = vadd.f32 %v1095_v7, %v1094_v1  ;;  %v1144_v12 = vadd.f32 %v1143_v8, %v1142_v2 }
 0x11c   : > { %v1097_v13 = vpop.f32.mrf.mxu0  ;;  %v1145_v14 = vpop.f32.mrf.mxu1 }
 0x11d   : > { %v1041_v15 = vpack.c.bf16 %v684_v9, %v684_v9  ;;  %v1057_v16 = vpack.c.bf16 %v700_v10, %v700_v10  ;;  %v565_v17 = vadd.f32 %v1096_v11, %v1561_v50  ;;  %v629_v18 = vadd.f32 %v1144_v12, %v1561_v50 }
 0x11e   : > { %v1098_v19 = vpop.f32.mrf.mxu0  ;;  %v1146_v20 = vpop.f32.mrf.mxu1 }
 0x11f   : > { %845 = vst.msk [vmem:[%s1568_s22 + $0x4] sm:$0xf] %vm843_vm0, %v1041_v15  ;;  %861 = vst.msk [vmem:[%s1568_s22 + $0x44] sm:$0xf] %vm843_vm0, %v1057_v16  ;;  %v685_v21 = vmax.f32 %v565_v17, 0.0  ;;  %v701_v22 = vmax.f32 %v629_v18, 0.0  ;;  %v1099_v23 = vadd.f32 %v1098_v19, %v1097_v13  ;;  %v1147_v24 = vadd.f32 %v1146_v20, %v1145_v14 }
 0x120   : > { %v1100_v25 = vpop.f32.mrf.mxu0  ;;  %v1148_v26 = vpop.f32.mrf.mxu1 }
 0x121   : > { %v1042_v27 = vpack.c.bf16 %v685_v21, %v685_v21  ;;  %v1058_v28 = vpack.c.bf16 %v701_v22, %v701_v22  ;;  %v568_v29 = vadd.f32 %v1099_v23, %v1561_v50  ;;  %v632_v30 = vadd.f32 %v1147_v24, %v1561_v50 }
 0x122   : > { %v1101_v31 = vpop.f32.mrf.mxu0  ;;  %v1149_v32 = vpop.f32.mrf.mxu1 }
 0x123   : > { %846 = vst.msk [vmem:[%s1568_s22 + $0x8] sm:$0xf] %vm843_vm0, %v1042_v27  ;;  %862 = vst.msk [vmem:[%s1568_s22 + $0x48] sm:$0xf] %vm843_vm0, %v1058_v28  ;;  %v686_v33 = vmax.f32 %v568_v29, 0.0  ;;  %v702_v34 = vmax.f32 %v632_v30, 0.0  ;;  %v1102_v35 = vadd.f32 %v1101_v31, %v1100_v25  ;;  %v1150_v36 = vadd.f32 %v1149_v32, %v1148_v26 }
 0x124   : > { %v1103_v37 = vpop.f32.mrf.mxu0  ;;  %v1151_v38 = vpop.f32.mrf.mxu1 }
 0x125   : > { %v1043_v39 = vpack.c.bf16 %v686_v33, %v686_v33  ;;  %v1059_v40 = vpack.c.bf16 %v702_v34, %v702_v34  ;;  %v573_v41 = vadd.f32 %v1102_v35, %v1561_v50  ;;  %v637_v42 = vadd.f32 %v1150_v36, %v1561_v50 }
 0x126   : > { %v1104_v43 = vpop.f32.mrf.mxu0  ;;  %v1152_v44 = vpop.f32.mrf.mxu1 }
 0x127   : > { %847 = vst.msk [vmem:[%s1568_s22 + $0xc] sm:$0xf] %vm843_vm0, %v1043_v39  ;;  %863 = vst.msk [vmem:[%s1568_s22 + $0x4c] sm:$0xf] %vm843_vm0, %v1059_v40  ;;  %v687_v45 = vmax.f32 %v573_v41, 0.0  ;;  %v703_v46 = vmax.f32 %v637_v42, 0.0  ;;  %v1105_v47 = vadd.f32 %v1104_v43, %v1103_v37  ;;  %v1153_v48 = vadd.f32 %v1152_v44, %v1151_v38 }
 0x128   : > { %v1106_v49 = vpop.f32.mrf.mxu0  ;;  %v1154_v51 = vpop.f32.mrf.mxu1 }
 0x129   : > { %v1044_v52 = vpack.c.bf16 %v687_v45, %v687_v45  ;;  %v1060_v53 = vpack.c.bf16 %v703_v46, %v703_v46  ;;  %v576_v54 = vadd.f32 %v1105_v47, %v1561_v50  ;;  %v640_v55 = vadd.f32 %v1153_v48, %v1561_v50 }
 0x12a   : > { %v1107_v56 = vpop.f32.mrf.mxu0  ;;  %v1155_v57 = vpop.f32.mrf.mxu1 }
 0x12b   : > { %848 = vst.msk [vmem:[%s1568_s22 + $0x10] sm:$0xf] %vm843_vm0, %v1044_v52  ;;  %864 = vst.msk [vmem:[%s1568_s22 + $0x50] sm:$0xf] %vm843_vm0, %v1060_v53  ;;  %v688_v58 = vmax.f32 %v576_v54, 0.0  ;;  %v704_v59 = vmax.f32 %v640_v55, 0.0  ;;  %v1108_v60 = vadd.f32 %v1107_v56, %v1106_v49  ;;  %v1156_v61 = vadd.f32 %v1155_v57, %v1154_v51 }
 0x12c   : > { %v1109_v62 = vpop.f32.mrf.mxu0  ;;  %v1157_v63 = vpop.f32.mrf.mxu1 }
 0x12d   : > { %v1045_v0 = vpack.c.bf16 %v688_v58, %v688_v58  ;;  %v1061_v1 = vpack.c.bf16 %v704_v59, %v704_v59  ;;  %v581_v2 = vadd.f32 %v1108_v60, %v1561_v50  ;;  %v645_v3 = vadd.f32 %v1156_v61, %v1561_v50 }
 0x12e   : > { %v1110_v4 = vpop.f32.mrf.mxu0  ;;  %v1158_v5 = vpop.f32.mrf.mxu1 }
 0x12f   : > { %849 = vst.msk [vmem:[%s1568_s22 + $0x14] sm:$0xf] %vm843_vm0, %v1045_v0  ;;  %865 = vst.msk [vmem:[%s1568_s22 + $0x54] sm:$0xf] %vm843_vm0, %v1061_v1  ;;  %v689_v6 = vmax.f32 %v581_v2, 0.0  ;;  %v705_v7 = vmax.f32 %v645_v3, 0.0  ;;  %v1111_v8 = vadd.f32 %v1110_v4, %v1109_v62  ;;  %v1159_v9 = vadd.f32 %v1158_v5, %v1157_v63 }
 0x130   : > { %v1112_v10 = vpop.f32.mrf.mxu0  ;;  %v1160_v11 = vpop.f32.mrf.mxu1 }
 0x131   : > { %v1046_v12 = vpack.c.bf16 %v689_v6, %v689_v6  ;;  %v1062_v13 = vpack.c.bf16 %v705_v7, %v705_v7  ;;  %v584_v14 = vadd.f32 %v1111_v8, %v1561_v50  ;;  %v648_v15 = vadd.f32 %v1159_v9, %v1561_v50 }
 0x132   : > { %v1113_v16 = vpop.f32.mrf.mxu0  ;;  %v1161_v17 = vpop.f32.mrf.mxu1 }
 0x133   : > { %850 = vst.msk [vmem:[%s1568_s22 + $0x18] sm:$0xf] %vm843_vm0, %v1046_v12  ;;  %866 = vst.msk [vmem:[%s1568_s22 + $0x58] sm:$0xf] %vm843_vm0, %v1062_v13  ;;  %v690_v18 = vmax.f32 %v584_v14, 0.0  ;;  %v706_v19 = vmax.f32 %v648_v15, 0.0  ;;  %v1114_v20 = vadd.f32 %v1113_v16, %v1112_v10  ;;  %v1162_v21 = vadd.f32 %v1161_v17, %v1160_v11 }
 0x134   : > { %v1115_v22 = vpop.f32.mrf.mxu0  ;;  %v1163_v23 = vpop.f32.mrf.mxu1 }
 0x135   : > { %v1047_v24 = vpack.c.bf16 %v690_v18, %v690_v18  ;;  %v1063_v25 = vpack.c.bf16 %v706_v19, %v706_v19  ;;  %v589_v26 = vadd.f32 %v1114_v20, %v1561_v50  ;;  %v653_v27 = vadd.f32 %v1162_v21, %v1561_v50 }
 0x136   : > { %v1116_v28 = vpop.f32.mrf.mxu0  ;;  %v1164_v29 = vpop.f32.mrf.mxu1 }
 0x137   : > { %851 = vst.msk [vmem:[%s1568_s22 + $0x1c] sm:$0xf] %vm843_vm0, %v1047_v24  ;;  %867 = vst.msk [vmem:[%s1568_s22 + $0x5c] sm:$0xf] %vm843_vm0, %v1063_v25  ;;  %v691_v30 = vmax.f32 %v589_v26, 0.0  ;;  %v707_v31 = vmax.f32 %v653_v27, 0.0  ;;  %v1117_v32 = vadd.f32 %v1116_v28, %v1115_v22  ;;  %v1165_v33 = vadd.f32 %v1164_v29, %v1163_v23 }
 0x138   : > { %v1118_v34 = vpop.f32.mrf.mxu0  ;;  %v1166_v35 = vpop.f32.mrf.mxu1 }
 0x139   : > { %v1048_v36 = vpack.c.bf16 %v691_v30, %v691_v30  ;;  %v1064_v37 = vpack.c.bf16 %v707_v31, %v707_v31  ;;  %v592_v38 = vadd.f32 %v1117_v32, %v1561_v50  ;;  %v656_v39 = vadd.f32 %v1165_v33, %v1561_v50 }
 0x13a   : > { %v1119_v40 = vpop.f32.mrf.mxu0  ;;  %v1167_v41 = vpop.f32.mrf.mxu1 }
 0x13b   : > { %852 = vst.msk [vmem:[%s1568_s22 + $0x20] sm:$0xf] %vm843_vm0, %v1048_v36  ;;  %868 = vst.msk [vmem:[%s1568_s22 + $0x60] sm:$0xf] %vm843_vm0, %v1064_v37  ;;  %v692_v42 = vmax.f32 %v592_v38, 0.0  ;;  %v708_v43 = vmax.f32 %v656_v39, 0.0  ;;  %v1120_v44 = vadd.f32 %v1119_v40, %v1118_v34  ;;  %v1168_v45 = vadd.f32 %v1167_v41, %v1166_v35 }
 0x13c   : > { %v1121_v46 = vpop.f32.mrf.mxu0  ;;  %v1169_v47 = vpop.f32.mrf.mxu1 }
 0x13d   : > { %v1049_v48 = vpack.c.bf16 %v692_v42, %v692_v42  ;;  %v1065_v49 = vpack.c.bf16 %v708_v43, %v708_v43  ;;  %v597_v51 = vadd.f32 %v1120_v44, %v1561_v50  ;;  %v661_v52 = vadd.f32 %v1168_v45, %v1561_v50 }
 0x13e   : > { %v1122_v53 = vpop.f32.mrf.mxu0  ;;  %v1170_v54 = vpop.f32.mrf.mxu1 }
 0x13f   : > { %853 = vst.msk [vmem:[%s1568_s22 + $0x24] sm:$0xf] %vm843_vm0, %v1049_v48  ;;  %869 = vst.msk [vmem:[%s1568_s22 + $0x64] sm:$0xf] %vm843_vm0, %v1065_v49  ;;  %v693_v55 = vmax.f32 %v597_v51, 0.0  ;;  %v709_v56 = vmax.f32 %v661_v52, 0.0  ;;  %v1123_v57 = vadd.f32 %v1122_v53, %v1121_v46  ;;  %v1171_v58 = vadd.f32 %v1170_v54, %v1169_v47 }
 0x140   : > { %v1124_v59 = vpop.f32.mrf.mxu0  ;;  %v1172_v60 = vpop.f32.mrf.mxu1 }
 0x141   : > { %v1050_v61 = vpack.c.bf16 %v693_v55, %v693_v55  ;;  %v1066_v62 = vpack.c.bf16 %v709_v56, %v709_v56  ;;  %v600_v63 = vadd.f32 %v1123_v57, %v1561_v50  ;;  %v664_v0 = vadd.f32 %v1171_v58, %v1561_v50 }
 0x142   : > { %v1125_v1 = vpop.f32.mrf.mxu0  ;;  %v1173_v2 = vpop.f32.mrf.mxu1 }
 0x143   : > { %854 = vst.msk [vmem:[%s1568_s22 + $0x28] sm:$0xf] %vm843_vm0, %v1050_v61  ;;  %870 = vst.msk [vmem:[%s1568_s22 + $0x68] sm:$0xf] %vm843_vm0, %v1066_v62  ;;  %v694_v3 = vmax.f32 %v600_v63, 0.0  ;;  %v710_v4 = vmax.f32 %v664_v0, 0.0  ;;  %v1126_v5 = vadd.f32 %v1125_v1, %v1124_v59  ;;  %v1174_v6 = vadd.f32 %v1173_v2, %v1172_v60 }
 0x144   : > { %v1127_v7 = vpop.f32.mrf.mxu0  ;;  %v1175_v8 = vpop.f32.mrf.mxu1 }
 0x145   : > { %v1051_v9 = vpack.c.bf16 %v694_v3, %v694_v3  ;;  %v1067_v10 = vpack.c.bf16 %v710_v4, %v710_v4  ;;  %v605_v11 = vadd.f32 %v1126_v5, %v1561_v50  ;;  %v669_v12 = vadd.f32 %v1174_v6, %v1561_v50 }
 0x146   : > { %v1128_v13 = vpop.f32.mrf.mxu0  ;;  %v1176_v14 = vpop.f32.mrf.mxu1 }
 0x147   : > { %855 = vst.msk [vmem:[%s1568_s22 + $0x2c] sm:$0xf] %vm843_vm0, %v1051_v9  ;;  %871 = vst.msk [vmem:[%s1568_s22 + $0x6c] sm:$0xf] %vm843_vm0, %v1067_v10  ;;  %v695_v15 = vmax.f32 %v605_v11, 0.0  ;;  %v711_v16 = vmax.f32 %v669_v12, 0.0  ;;  %v1129_v17 = vadd.f32 %v1128_v13, %v1127_v7  ;;  %v1177_v18 = vadd.f32 %v1176_v14, %v1175_v8 }
 0x148   : > { %v1130_v19 = vpop.f32.mrf.mxu0  ;;  %v1178_v20 = vpop.f32.mrf.mxu1 }
 0x149   : > { %v1052_v21 = vpack.c.bf16 %v695_v15, %v695_v15  ;;  %v1068_v22 = vpack.c.bf16 %v711_v16, %v711_v16  ;;  %v608_v23 = vadd.f32 %v1129_v17, %v1561_v50  ;;  %v672_v24 = vadd.f32 %v1177_v18, %v1561_v50 }
 0x14a   : > { %v1131_v25 = vpop.f32.mrf.mxu0  ;;  %v1179_v26 = vpop.f32.mrf.mxu1 }
 0x14b   : > { %856 = vst.msk [vmem:[%s1568_s22 + $0x30] sm:$0xf] %vm843_vm0, %v1052_v21  ;;  %872 = vst.msk [vmem:[%s1568_s22 + $0x70] sm:$0xf] %vm843_vm0, %v1068_v22  ;;  %v696_v27 = vmax.f32 %v608_v23, 0.0  ;;  %v712_v28 = vmax.f32 %v672_v24, 0.0  ;;  %v1132_v29 = vadd.f32 %v1131_v25, %v1130_v19  ;;  %v1180_v30 = vadd.f32 %v1179_v26, %v1178_v20 }
 0x14c   : > { %v1133_v31 = vpop.f32.mrf.mxu0  ;;  %v1181_v32 = vpop.f32.mrf.mxu1 }
 0x14d   : > { %v1053_v33 = vpack.c.bf16 %v696_v27, %v696_v27  ;;  %v1069_v34 = vpack.c.bf16 %v712_v28, %v712_v28  ;;  %v613_v35 = vadd.f32 %v1132_v29, %v1561_v50  ;;  %v677_v36 = vadd.f32 %v1180_v30, %v1561_v50 }
 0x14e   : > { %v1134_v37 = vpop.f32.mrf.mxu0  ;;  %v1182_v38 = vpop.f32.mrf.mxu1 }
 0x14f   : > { %857 = vst.msk [vmem:[%s1568_s22 + $0x34] sm:$0xf] %vm843_vm0, %v1053_v33  ;;  %873 = vst.msk [vmem:[%s1568_s22 + $0x74] sm:$0xf] %vm843_vm0, %v1069_v34  ;;  %v697_v39 = vmax.f32 %v613_v35, 0.0  ;;  %v713_v40 = vmax.f32 %v677_v36, 0.0  ;;  %v1135_v41 = vadd.f32 %v1134_v37, %v1133_v31  ;;  %v1183_v42 = vadd.f32 %v1182_v38, %v1181_v32 }
 0x151   : > { %v1054_v43 = vpack.c.bf16 %v697_v39, %v697_v39  ;;  %v1070_v44 = vpack.c.bf16 %v713_v40, %v713_v40  ;;  %v616_v45 = vadd.f32 %v1135_v41, %v1561_v50  ;;  %v680_v46 = vadd.f32 %v1183_v42, %v1561_v50 }
 0x153   : > { %858 = vst.msk [vmem:[%s1568_s22 + $0x38] sm:$0xf] %vm843_vm0, %v1054_v43  ;;  %874 = vst.msk [vmem:[%s1568_s22 + $0x78] sm:$0xf] %vm843_vm0, %v1070_v44  ;;  %v698_v47 = vmax.f32 %v616_v45, 0.0  ;;  %v714_v48 = vmax.f32 %v680_v46, 0.0 }
 0x155   : > { %v1055_v49 = vpack.c.bf16 %v698_v47, %v698_v47  ;;  %v1071_v51 = vpack.c.bf16 %v714_v48, %v714_v48 }
 0x157   : > { %859 = vst.msk [vmem:[%s1568_s22 + $0x3c] sm:$0xf] %vm843_vm0, %v1055_v49  ;;  %875 = vst.msk [vmem:[%s1568_s22 + $0x7c] sm:$0xf] %vm843_vm0, %v1071_v51 }
 0x158 PF: > { %p13_p9 = scmp.ge.s32.totalorder %s1412_s17, 4   ;;  %s1686_s12 = smov %s1359_s13 }
 0x159   : > { %s1687_s13 = smov %s1363_s14  ;;  %s1688_s14 = smov %s1422_s20 }
 0x15a   : > { %s1689_s15 = smov %s1412_s17  ;;  %15 = sbr.rel (!%p13_p9) target bundleno = 3 (0x3), region = 72 }
 0x15f   :  { %898 = vsyncpa [#allocation3], 1 }
 0x160   :  { %900 = vsyncpa [#allocation3 + $0x1], 1 }

</bundles_post_ra>
